<compile_context>
chip_gen: v5e
topology: v5e:2x2
jax: 0.10.0
libtpu: 0.0.40
codegen_flags: <defaults>
</compile_context>

<pallas_src>
import functools

import jax
import jax.numpy as jnp
import numpy as np
from jax.experimental import pallas as pl
from jax.experimental.pallas import tpu as pltpu

# ---------------- network architecture (as the module's __init__ implies) ----
NETWORK_ARCHITECTURE = {
    "n_hidden_layers": 3,   # -> 2 hidden (H->H) layers after the input layer
    "neurons": 32,
    "act_string": "tanh",
    "retrain": 0,
    "dropout_rate": 0.0,    # inference: dropout == identity
}

INPUT_DIM = 2
CHUNK_P = 512      # inner vreg-resident chunk (lanes)
MAX_TILE_P = 8192  # point-dimension tile upper bound (lane axis)


def _act(x):
    # act_string == 'tanh' -> EUP transcendental
    return jnp.tanh(x)


def _choose_tile_p(P):
    """Pick a point tile that is a multiple of CHUNK_P, <= MAX_TILE_P, and
    yields an even, low-padding number of grid steps for large P (balanced
    work across v7x's two TensorCores)."""
    if P <= 2 * CHUNK_P:
        return CHUNK_P
    n = 2
    while True:
        tile = ((P + n - 1) // n + CHUNK_P - 1) // CHUNK_P * CHUNK_P
        if tile <= MAX_TILE_P:
            return int(tile)
        n += 2


def kappa_kernel(x_ref, w_in_ref, b_in_ref, w_h_ref, b_h_ref,
                 w_out_t_ref, o_ref, *, n_hidden_layers, tile_p):
    """One tile of points (lane axis) through the whole MLP, processed in
    512-lane chunks so every intermediate stays in vregs.

    x_ref    : [2, TILE_P]        rows = (x1, x2), f32
    w_in     : [H, 2] f32,        b_in : [H, 1] f32
    w_h      : [L-1, H, H] bf16,  b_h  : [L-1, H, 1] f32
    w_out_t  : [1, H] f32         (pre-transposed output weight)
    o_ref    : [1, TILE_P] f32    (output bias added in the wrapper)
    """
    w_in = w_in_ref[...]                 # [H, 2]
    b_in = b_in_ref[...]                 # [H, 1]
    w_out_t = w_out_t_ref[...]           # [1, H]

    n_chunks = tile_p // CHUNK_P
    for c in range(n_chunks):            # static unroll; chunks are independent
        lo, hi = c * CHUNK_P, (c + 1) * CHUNK_P
        xc = x_ref[:, lo:hi]             # [2, CHUNK_P]
        x1_row = xc[0:1, :]              # [1, CHUNK_P]
        x2_row = xc[1:2, :]              # [1, CHUNK_P]

        # input layer as a VPU broadcast-FMA (K=2 would waste the MXU)
        h = _act(w_in[:, 0:1] * x1_row + w_in[:, 1:2] * x2_row + b_in)  # [H, CHUNK_P]

        # hidden layers: bf16 operands, f32 accumulation on the MXU
        for k in range(n_hidden_layers - 1):
            wk = w_h_ref[k]              # [H, H] bf16 (cast in wrapper)
            bk = b_h_ref[k]              # [H, 1] f32
            z = jnp.dot(wk, h.astype(jnp.bfloat16),
                        preferred_element_type=jnp.float32) + bk
            h = _act(z)                  # tanh in f32 (v5e EUP has no bf16)

        # output layer (no activation): 1xH MXU dot, stays lane-dense
        out = jnp.dot(w_out_t, h, preferred_element_type=jnp.float32)  # [1, CHUNK_P]
        o_ref[:, lo:hi] = out.astype(o_ref.dtype)


def make_params(arch, key):
    """Deterministic kaiming-uniform-like init (a=0.01, leaky_relu gain), zero
    biases. Weights stored torch-style [out_features, in_features]."""
    H = arch["neurons"]
    L = arch["n_hidden_layers"]
    a = 0.01
    gain = float(np.sqrt(2.0 / (1.0 + a * a)))

    def kaiming_uniform(key, fan_in, shape):
        bound = gain * np.sqrt(3.0 / fan_in)
        return jax.random.uniform(key, shape, jnp.float32, -bound, bound)

    k_in, k_h, k_out = jax.random.split(key, 3)

    w_in = kaiming_uniform(k_in, INPUT_DIM, (H, INPUT_DIM))          # [H, 2]
    b_in = jnp.zeros((H, 1), jnp.float32)

    hk = jax.random.split(k_h, max(L - 1, 1))
    w_h = jnp.stack([kaiming_uniform(hk[i], H, (H, H)) for i in range(L - 1)], axis=0)
    b_h = jnp.zeros((L - 1, H, 1), jnp.float32)

    w_out = kaiming_uniform(k_out, H, (H, 1))                        # [H, 1]
    b_out = jnp.zeros((), jnp.float32)                               # scalar

    return dict(w_in=w_in, b_in=b_in, w_h=w_h, b_h=b_h, w_out=w_out, b_out=b_out)


def kappa_opt_forward(params, x1, x2, arch=NETWORK_ARCHITECTURE):
    """Pallas-accelerated equivalent of KappaOpt.forward(x1, x2)."""
    assert x1.shape == x2.shape
    orig_shape = x1.shape
    H = arch["neurons"]
    L = arch["n_hidden_layers"]

    # glue: flatten point grid, point axis on lanes -> x is [2, P_pad]
    x = jnp.stack([x1.reshape(-1), x2.reshape(-1)], axis=0).astype(jnp.float32)
    P = x.shape[1]
    tile_p = _choose_tile_p(P)
    P_pad = int(pl.cdiv(P, tile_p) * tile_p)
    if P_pad != P:
        # padding is already minimized by the balanced tile choice above
        x = jnp.pad(x, ((0, 0), (0, P_pad - P)))

    grid = (P_pad // tile_p,)

    # hidden weights cast once to bf16 (halves the weight DMA, bf16-native MXU)
    w_h_bf16 = params["w_h"].astype(jnp.bfloat16)
    # output weight pre-transposed to [1, H] for the 1xH MXU dot
    w_out_t = params["w_out"].reshape(1, H).astype(jnp.float32)

    kernel = functools.partial(kappa_kernel, n_hidden_layers=L, tile_p=tile_p)

    out = pl.pallas_call(
        kernel,
        out_shape=jax.ShapeDtypeStruct((1, P_pad), jnp.float32),
        grid_spec=pltpu.PrefetchScalarGridSpec(
            num_scalar_prefetch=0,
            grid=grid,
            in_specs=[
                pl.BlockSpec((2, tile_p), lambda i: (0, i)),            # x  (lane-dense)
                pl.BlockSpec((H, INPUT_DIM), lambda i: (0, 0)),         # w_in
                pl.BlockSpec((H, 1), lambda i: (0, 0)),                 # b_in
                pl.BlockSpec((L - 1, H, H), lambda i: (0, 0, 0)),       # w_h (bf16)
                pl.BlockSpec((L - 1, H, 1), lambda i: (0, 0, 0)),       # b_h
                pl.BlockSpec((1, H), lambda i: (0, 0)),                 # w_out^T
            ],
            out_specs=pl.BlockSpec((1, tile_p), lambda i: (0, i)),      # lane-dense out
        ),
        compiler_params=pltpu.CompilerParams(
            dimension_semantics=("parallel",),
        ),
    )(x, params["w_in"], params["b_in"], w_h_bf16, params["b_h"], w_out_t)

    # output-layer scalar bias added here (avoids a padded (1,1) VMEM block per step)
    out = out[0, :P] + params["b_out"]
    return out.reshape(orig_shape)


def kappa_opt_reference(params, x1, x2, arch=NETWORK_ARCHITECTURE):
    """Pure-JAX f32 reference of the same forward (for correctness check)."""
    L = arch["n_hidden_layers"]
    x = jnp.stack([x1.reshape(-1), x2.reshape(-1)], axis=0).astype(jnp.float32)  # [2, P]
    h = jnp.tanh(params["w_in"] @ x + params["b_in"])
    for k in range(L - 1):
        h = jnp.tanh(params["w_h"][k] @ h + params["b_h"][k])
    out = jnp.sum(params["w_out"] * h, axis=0) + params["b_out"]
    return out.reshape(x1.shape)


if __name__ == "__main__":
    key = jax.random.PRNGKey(0)
    k_params, k_x1, k_x2 = jax.random.split(key, 3)

    params = make_params(NETWORK_ARCHITECTURE, k_params)

    # small point grid: batch=2, seq=64 -> 128 flattened points
    x1 = jax.random.uniform(k_x1, (2, 64), jnp.float32)
    x2 = jax.random.uniform(k_x2, (2, 64), jnp.float32)

    y = kappa_opt_forward(params, x1, x2)
    y = jax.block_until_ready(y)

    y_ref = jax.block_until_ready(kappa_opt_reference(params, x1, x2))
    assert y.shape == x1.shape
    # tolerance loosened vs the f32 reference because the hidden-layer matmuls
    # use bf16 operands (f32 accumulation) on the MXU
    np.testing.assert_allclose(np.asarray(y), np.asarray(y_ref), rtol=3e-2, atol=3e-2)

    print("KERNEL_OK")
</pallas_src>

<mosaic_0001>
module attributes {stable_mosaic.version = 11 : i64} {
  func.func @kappa_kernel(%arg0: i32, %arg1: memref<2x512xf32, #tpu.memory_space<vmem>>, %arg2: memref<32x2xf32, #tpu.memory_space<vmem>>, %arg3: memref<32x1xf32, #tpu.memory_space<vmem>>, %arg4: memref<2x32x32xbf16, #tpu.memory_space<vmem>>, %arg5: memref<2x32x1xf32, #tpu.memory_space<vmem>>, %arg6: memref<1x32xf32, #tpu.memory_space<vmem>>, %arg7: memref<1x512xf32, #tpu.memory_space<vmem>>) attributes {dimension_semantics = [#tpu.dimension_semantics<parallel>], iteration_bounds = array<i64: 1>, scalar_prefetch = 0 : i64, scratch_operands = 0 : i64, tpu.core_type = #tpu.core_type<tc>, window_params = [{transform_indices = @transform_0, window_bounds = array<i64: 2, 512>}, {pipeline_mode = #tpu.pipeline_mode<synchronous>, transform_indices = @transform_1, window_bounds = array<i64: 32, 2>}, {pipeline_mode = #tpu.pipeline_mode<synchronous>, transform_indices = @transform_2, window_bounds = array<i64: 32, 1>}, {pipeline_mode = #tpu.pipeline_mode<synchronous>, transform_indices = @transform_3, window_bounds = array<i64: 2, 32, 32>}, {pipeline_mode = #tpu.pipeline_mode<synchronous>, transform_indices = @transform_4, window_bounds = array<i64: 2, 32, 1>}, {pipeline_mode = #tpu.pipeline_mode<synchronous>, transform_indices = @transform_5, window_bounds = array<i64: 1, 32>}, {transform_indices = @transform_6, window_bounds = array<i64: 1, 512>}]} {
    %c0 = arith.constant 0 : index
    %c0_0 = arith.constant 0 : index
    %0 = vector.load %arg2[%c0, %c0_0] : memref<32x2xf32, #tpu.memory_space<vmem>>, vector<32x2xf32>
    %c0_1 = arith.constant 0 : index
    %c0_2 = arith.constant 0 : index
    %1 = vector.load %arg3[%c0_1, %c0_2] : memref<32x1xf32, #tpu.memory_space<vmem>>, vector<32x1xf32>
    %c0_3 = arith.constant 0 : index
    %c0_4 = arith.constant 0 : index
    %2 = vector.load %arg6[%c0_3, %c0_4] : memref<1x32xf32, #tpu.memory_space<vmem>>, vector<1x32xf32>
    %c0_5 = arith.constant 0 : index
    %c0_6 = arith.constant 0 : index
    %3 = vector.load %arg1[%c0_5, %c0_6] : memref<2x512xf32, #tpu.memory_space<vmem>>, vector<2x512xf32>
    %4 = vector.extract_strided_slice %3 {offsets = [0, 0], sizes = [1, 512], strides = [1, 1]} : vector<2x512xf32> to vector<1x512xf32>
    %5 = vector.extract_strided_slice %3 {offsets = [1, 0], sizes = [1, 512], strides = [1, 1]} : vector<2x512xf32> to vector<1x512xf32>
    %6 = vector.extract_strided_slice %0 {offsets = [0, 0], sizes = [32, 1], strides = [1, 1]} : vector<32x2xf32> to vector<32x1xf32>
    %7 = vector.broadcast %6 : vector<32x1xf32> to vector<32x512xf32>
    %8 = vector.broadcast %4 : vector<1x512xf32> to vector<32x512xf32>
    %9 = arith.mulf %7, %8 : vector<32x512xf32>
    %10 = vector.extract_strided_slice %0 {offsets = [0, 1], sizes = [32, 1], strides = [1, 1]} : vector<32x2xf32> to vector<32x1xf32>
    %11 = vector.broadcast %10 : vector<32x1xf32> to vector<32x512xf32>
    %12 = vector.broadcast %5 : vector<1x512xf32> to vector<32x512xf32>
    %13 = arith.mulf %11, %12 : vector<32x512xf32>
    %14 = arith.addf %9, %13 : vector<32x512xf32>
    %15 = vector.broadcast %1 : vector<32x1xf32> to vector<32x512xf32>
    %16 = arith.addf %14, %15 : vector<32x512xf32>
    %17 = math.tanh %16 : vector<32x512xf32>
    %c0_7 = arith.constant 0 : index
    %c0_8 = arith.constant 0 : index
    %c0_9 = arith.constant 0 : index
    %18 = vector.load %arg4[%c0_7, %c0_8, %c0_9] : memref<2x32x32xbf16, #tpu.memory_space<vmem>>, vector<1x32x32xbf16>
    %19 = vector.shape_cast %18 : vector<1x32x32xbf16> to vector<32x32xbf16>
    %c0_10 = arith.constant 0 : index
    %c0_11 = arith.constant 0 : index
    %c0_12 = arith.constant 0 : index
    %20 = vector.load %arg5[%c0_10, %c0_11, %c0_12] : memref<2x32x1xf32, #tpu.memory_space<vmem>>, vector<1x32x1xf32>
    %21 = vector.shape_cast %20 : vector<1x32x1xf32> to vector<32x1xf32>
    %22 = arith.truncf %17 : vector<32x512xf32> to vector<32x512xbf16>
    %cst = arith.constant dense<0.000000e+00> : vector<32x512xf32>
    %23 = tpu.matmul %19, %22, %cst {dimension_numbers = #tpu.dot_dimension_numbers<[1], [0], [0], [1], [0, 0, 1, 1], [], []>} : vector<32x32xbf16>, vector<32x512xbf16>, vector<32x512xf32> -> vector<32x512xf32>
    %24 = vector.broadcast %21 : vector<32x1xf32> to vector<32x512xf32>
    %25 = arith.addf %23, %24 : vector<32x512xf32>
    %26 = math.tanh %25 : vector<32x512xf32>
    %c1 = arith.constant 1 : index
    %c0_13 = arith.constant 0 : index
    %c0_14 = arith.constant 0 : index
    %27 = vector.load %arg4[%c1, %c0_13, %c0_14] : memref<2x32x32xbf16, #tpu.memory_space<vmem>>, vector<1x32x32xbf16>
    %28 = vector.shape_cast %27 : vector<1x32x32xbf16> to vector<32x32xbf16>
    %c1_15 = arith.constant 1 : index
    %c0_16 = arith.constant 0 : index
    %c0_17 = arith.constant 0 : index
    %29 = vector.load %arg5[%c1_15, %c0_16, %c0_17] : memref<2x32x1xf32, #tpu.memory_space<vmem>>, vector<1x32x1xf32>
    %30 = vector.shape_cast %29 : vector<1x32x1xf32> to vector<32x1xf32>
    %31 = arith.truncf %26 : vector<32x512xf32> to vector<32x512xbf16>
    %cst_18 = arith.constant dense<0.000000e+00> : vector<32x512xf32>
    %32 = tpu.matmul %28, %31, %cst_18 {dimension_numbers = #tpu.dot_dimension_numbers<[1], [0], [0], [1], [0, 0, 1, 1], [], []>} : vector<32x32xbf16>, vector<32x512xbf16>, vector<32x512xf32> -> vector<32x512xf32>
    %33 = vector.broadcast %30 : vector<32x1xf32> to vector<32x512xf32>
    %34 = arith.addf %32, %33 : vector<32x512xf32>
    %35 = math.tanh %34 : vector<32x512xf32>
    %cst_19 = arith.constant dense<0.000000e+00> : vector<1x512xf32>
    %36 = tpu.matmul %2, %35, %cst_19 {dimension_numbers = #tpu.dot_dimension_numbers<[1], [0], [0], [1], [0, 0, 1, 1], [], []>} : vector<1x32xf32>, vector<32x512xf32>, vector<1x512xf32> -> vector<1x512xf32>
    %c0_20 = arith.constant 0 : index
    %c0_21 = arith.constant 0 : index
    %37 = vector.load %arg7[%c0_20, %c0_21] : memref<1x512xf32, #tpu.memory_space<vmem>>, vector<1x512xf32>
    tpu.vector_store %arg7[%c0_20, %c0_21], %36 {strides = array<i32>} : memref<1x512xf32, #tpu.memory_space<vmem>>, vector<1x512xf32>,
    return
  }
  func.func @transform_0(%arg0: i32) -> (i32, i32) {
    %c0_i32 = arith.constant 0 : i32
    %c0_i32_0 = arith.constant 0 : i32
    return %c0_i32, %arg0 : i32, i32
  }
  func.func @transform_1(%arg0: i32) -> (i32, i32) {
    %c0_i32 = arith.constant 0 : i32
    %c0_i32_0 = arith.constant 0 : i32
    %c0_i32_1 = arith.constant 0 : i32
    return %c0_i32, %c0_i32_0 : i32, i32
  }
  func.func @transform_2(%arg0: i32) -> (i32, i32) {
    %c0_i32 = arith.constant 0 : i32
    %c0_i32_0 = arith.constant 0 : i32
    %c0_i32_1 = arith.constant 0 : i32
    return %c0_i32, %c0_i32_0 : i32, i32
  }
  func.func @transform_3(%arg0: i32) -> (i32, i32, i32) {
    %c0_i32 = arith.constant 0 : i32
    %c0_i32_0 = arith.constant 0 : i32
    %c0_i32_1 = arith.constant 0 : i32
    %c0_i32_2 = arith.constant 0 : i32
    return %c0_i32, %c0_i32_0, %c0_i32_1 : i32, i32, i32
  }
  func.func @transform_4(%arg0: i32) -> (i32, i32, i32) {
    %c0_i32 = arith.constant 0 : i32
    %c0_i32_0 = arith.constant 0 : i32
    %c0_i32_1 = arith.constant 0 : i32
    %c0_i32_2 = arith.constant 0 : i32
    return %c0_i32, %c0_i32_0, %c0_i32_1 : i32, i32, i32
  }
  func.func @transform_5(%arg0: i32) -> (i32, i32) {
    %c0_i32 = arith.constant 0 : i32
    %c0_i32_0 = arith.constant 0 : i32
    %c0_i32_1 = arith.constant 0 : i32
    return %c0_i32, %c0_i32_0 : i32, i32
  }
  func.func @transform_6(%arg0: i32) -> (i32, i32) {
    %c0_i32 = arith.constant 0 : i32
    %c0_i32_0 = arith.constant 0 : i32
    return %c0_i32, %arg0 : i32, i32
  }
}

</mosaic_0001>

<bundles_post_ra>
// kernel: tpu_custom_call.1
= control target key start
LH: loop header
LB: loop body
LE: loop exit
PB: predicated region body
PF: predicated region fallthrough
CT: control target
= control target key end

     0   :  { %v783_v2 = vmov 1   ;;  %v784_v3 = vmov 0   ;;  %s922_s0 = inlined_call_operand.vmem [shape: f32[2,512], index: 0, kind: input, shape index: {}]   ;;  %s923_s1 = inlined_call_operand.vmem [shape: f32[32,2], index: 1, kind: input, shape index: {}]   ;;  %s924_s2 = inlined_call_operand.vmem [shape: f32[32,1], index: 2, kind: input, shape index: {}]   ;;  %s925_s3 = inlined_call_operand.vmem [shape: bf16[2,32,32], index: 3, kind: input, shape index: {}]   ;;  %s926_s4 = inlined_call_operand.vmem [shape: f32[2,32,1], index: 4, kind: input, shape index: {}]   ;;  %s927_s5 = inlined_call_operand.vmem [shape: f32[1,32], index: 5, kind: input, shape index: {}]   ;;  %s928_s6 = inlined_call_operand.hbm [shape: f32[1,512], index: 6, kind: output, shape index: {}]  }
   0x1   :  { %v27_v0 = vld [vmem:[%s923_s1 + $0x10] sm:$0xff]  ;;  %v25_v1 = vld [vmem:[%s923_s1] sm:$0xff]  ;;  %658 = vset.pattern.permute.xlu0 %v783_v2  ;;  %656 = vset.pattern.permute.xlu1 %v783_v2 }
   0x2   :  { %657 = vset.pattern.permute.xlu2 %v784_v3  ;;  %93 = vperm.xlu1 %656, %v27_v0  }
   0x3   :  { %85 = vperm.xlu0 %658, %v25_v1   ;;  %37 = vperm.xlu2 %657, %v25_v1  }
   0x4   :  { %11 = vsyncpa [#allocation3], 0  ;;  %v28_v4 = vld [vmem:[%s923_s1 + $0x18] sm:$0xff]  ;;  %v26_v5 = vld [vmem:[%s923_s1 + $0x8] sm:$0xff]  ;;  %vm242_vm0 = vcmask 261120   ;;  %vm577_vm1 = vcmask 1040384  }
   0x5   :  { %v31_v6 = vld [vmem:[%s924_s2 + $0x10] sm:$0xff]  ;;  %v29_v7 = vld [vmem:[%s924_s2] sm:$0xff]  ;;  %v32_v8 = vld [vmem:[%s924_s2 + $0x18] sm:$0xff]  ;;  %vm579_vm2 = vcmask 1042434   ;;  %s596_s14 = sshll.u32 %s928_s6, 4  ;;  %vm581_vm3 = vcmask 1041408   ;;  %s597_s14 = int_to_ptr.hbm [resolvable:$true] %s596_s14 }
   0x6   :  { %v30_v9 = vld [vmem:[%s924_s2 + $0x8] sm:$0xff]  ;;  %v203_v10 = vld [vmem:[%s926_s4 + $0x18] sm:$0xff]  ;;  %v202_v11 = vld [vmem:[%s926_s4 + $0x10] sm:$0xff] }
   0x7   :  { %v628_v12 = vld [vmem:[%s926_s4 + $0x38] sm:$0xff]  ;;  %v201_v13 = vld [vmem:[%s926_s4 + $0x8] sm:$0xff]  ;;  %v200_v14 = vld [vmem:[%s926_s4] sm:$0xff] }
   0x8   :  { %v625_v15 = vld [vmem:[%s926_s4 + $0x20] sm:$0xff]  ;;  %v626_v16 = vld [vmem:[%s926_s4 + $0x28] sm:$0xff]  ;;  %v627_v17 = vld [vmem:[%s926_s4 + $0x30] sm:$0xff] }
   0x9   :  { %v34_v20 = vld [vmem:[%s922_s0] sm:$0xff] }
   0xa   :  { %97 = vperm.xlu1 %656, %v28_v4   ;;  %v56_v21 = vperm.slane %v34_v20, 0  ;;  %v100_v22 = vperm.slane %v34_v20, 1  ;;  %v57_v24 = vperm.slane %v34_v20, 2  ;;  %v101_v25 = vperm.slane %v34_v20, 3 }
   0xb   :  { %659 = vset.pattern.permute.xlu0 %v784_v3  ;;  %42 = vperm.xlu2 %657, %v26_v5   ;;  %v58_v27 = vperm.slane %v34_v20, 4  ;;  %v59_v28 = vperm.slane %v34_v20, 6  ;;  %v102_v29 = vperm.slane %v34_v20, 5  ;;  %v103_v30 = vperm.slane %v34_v20, 7 }
   0xc   :  { %47 = vperm.xlu0 %659, %v27_v0   ;;  %v64_v31 = vperm.slane %v56_v21, 0  ;;  %v108_v32 = vperm.slane %v100_v22, 1  ;;  %v65_v34 = vperm.slane %v57_v24, 0  ;;  %v109_v35 = vperm.slane %v101_v25, 1 }
   0xd   :  { %v66_v36 = vperm.slane %v58_v27, 0  ;;  %v874_v37 = vperm.slane %v59_v28, 0  ;;  %v110_v38 = vperm.slane %v102_v29, 1  ;;  %v111_v39 = vperm.slane %v103_v30, 1 }
  0x12   :  { %89 = vperm.xlu1 %656, %v26_v5  }
  0x13   :  { %156 = vperm.xlu2 %657, %v31_v6  }
  0x14   :  { %52 = vperm.xlu0 %659, %v28_v4  }
  0x1a   :  { %660 = vset.pattern.permute.xlu1 %v784_v3 }
  0x1b   :  { %146 = vperm.xlu2 %657, %v29_v7   ;;  %161 = vperm.xlu1 %660, %v32_v8  }
  0x1c   :  { %151 = vperm.xlu0 %659, %v30_v9  }
  0x23   :  { %229 = vperm.xlu2 %657, %v203_v10   ;;  %224 = vperm.xlu1 %660, %v202_v11  }
  0x24   :  { %376 = vperm.xlu0 %659, %v628_v12  }
  0x2b   :  { %219 = vperm.xlu2 %657, %v201_v13   ;;  %214 = vperm.xlu1 %660, %v200_v14  }
  0x2c   :  { %361 = vperm.xlu0 %659, %v625_v15  }
  0x33   :  { %366 = vperm.xlu2 %657, %v626_v16   ;;  %371 = vperm.xlu1 %660, %v627_v17  }
  0x5d   :  { %v38_v18 = vpop.permute.xlu2 %37 }
  0x5e   :  { %v68_v40 = vmul.f32 %v64_v31, %v38_v18  ;;  %v69_v43 = vmul.f32 %v65_v34, %v38_v18  ;;  %v70_v45 = vmul.f32 %v66_v36, %v38_v18  ;;  %v71_v46 = vmul.f32 %v874_v37, %v38_v18 }
  0x65   :  { %v869_v19 = vpop.permute.xlu2 %42 }
  0x66   :  { %v72_v62 = vmul.f32 %v64_v31, %v869_v19  ;;  %v73_v2 = vmul.f32 %v65_v34, %v869_v19  ;;  %v74_v6 = vmul.f32 %v66_v36, %v869_v19 }
  0x6d   :  { %v157_v33 = vpop.permute.xlu2 %156 }
  0x74   :  { %v94_v23 = vpop.permute.xlu1 %93 }
  0x75   :  { %v86_v26 = vpop.permute.xlu0 %85  ;;  %v120_v54 = vmul.f32 %v108_v32, %v94_v23  ;;  %v147_v55 = vpop.permute.xlu2 %146  ;;  %v121_v59 = vmul.f32 %v109_v35, %v94_v23  ;;  %v122_v63 = vmul.f32 %v110_v38, %v94_v23  ;;  %v123_v3 = vmul.f32 %v111_v39, %v94_v23 }
  0x76   :  { %v112_v41 = vmul.f32 %v108_v32, %v86_v26  ;;  %v113_v44 = vmul.f32 %v109_v35, %v86_v26  ;;  %v114_v47 = vmul.f32 %v110_v38, %v86_v26  ;;  %v115_v48 = vmul.f32 %v111_v39, %v86_v26 }
  0x78   :  { %v128_v50 = vadd.f32 %v112_v41, %v68_v40  ;;  %v129_v52 = vadd.f32 %v113_v44, %v69_v43  ;;  %v130_v56 = vadd.f32 %v114_v47, %v70_v45  ;;  %v131_v57 = vadd.f32 %v115_v48, %v71_v46 }
  0x7a   :  { %v164_v61 = vadd.f32 %v147_v55, %v128_v50  ;;  %v165_v5 = vadd.f32 %v147_v55, %v129_v52  ;;  %v166_v9 = vadd.f32 %v147_v55, %v130_v56  ;;  %v167_v10 = vadd.f32 %v147_v55, %v131_v57 }
  0x7c   :  { %v98_v42 = vpop.permute.xlu1 %97  ;;  %661 = vtanh.f32 %v164_v61 }
  0x7d   :  { %v124_v11 = vmul.f32 %v108_v32, %v98_v42  ;;  %v125_v12 = vmul.f32 %v109_v35, %v98_v42  ;;  %663 = vtanh.f32 %v165_v5  ;;  %v126_v22 = vmul.f32 %v110_v38, %v98_v42 }
  0x7e   :  { %v48_v49 = vpop.permute.xlu0 %47  ;;  %v127_v23 = vmul.f32 %v111_v39, %v98_v42  ;;  %665 = vtanh.f32 %v166_v9 }
  0x7f   :  { %v76_v51 = vmul.f32 %v64_v31, %v48_v49  ;;  %v77_v53 = vmul.f32 %v65_v34, %v48_v49  ;;  %v78_v58 = vmul.f32 %v66_v36, %v48_v49  ;;  %v79_v60 = vmul.f32 %v874_v37, %v48_v49 }
  0x80   :  { %667 = vtanh.f32 %v167_v10 }
  0x81   :  { %v136_v0 = vadd.f32 %v120_v54, %v76_v51  ;;  %v137_v4 = vadd.f32 %v121_v59, %v77_v53  ;;  %v138_v7 = vadd.f32 %v122_v63, %v78_v58  ;;  %v139_v13 = vadd.f32 %v123_v3, %v79_v60 }
  0x83   :  { %v172_v17 = vadd.f32 %v157_v33, %v136_v0  ;;  %v173_v21 = vadd.f32 %v157_v33, %v137_v4  ;;  %v174_v24 = vadd.f32 %v157_v33, %v138_v7  ;;  %v175_v27 = vadd.f32 %v157_v33, %v139_v13  ;;  %v649_v4 = vld [vmem:[%s925_s3] sm:$0xff] }
  0x84   :  { %v90_v1 = vpop.permute.xlu1 %89  ;;  %v75_v33 = vmul.f32 %v874_v37, %v869_v19 }
  0x85   :  { %v116_v18 = vmul.f32 %v108_v32, %v90_v1  ;;  %v117_v25 = vmul.f32 %v109_v35, %v90_v1  ;;  %v118_v26 = vmul.f32 %v110_v38, %v90_v1  ;;  %669 = vtanh.f32 %v172_v17 }
  0x86   :  { %v53_v8 = vpop.permute.xlu0 %52  ;;  %671 = vtanh.f32 %v173_v21 }
  0x87   :  { %v80_v14 = vmul.f32 %v64_v31, %v53_v8  ;;  %v81_v15 = vmul.f32 %v65_v34, %v53_v8  ;;  %v82_v16 = vmul.f32 %v66_v36, %v53_v8  ;;  %v83_v20 = vmul.f32 %v874_v37, %v53_v8  ;;  %v662_v31 = vpop.eup %661  ;;  %v650_v8 = vld [vmem:[%s925_s3 + $0x8] sm:$0xff] }
  0x88   :  { %v119_v34 = vmul.f32 %v111_v39, %v90_v1  ;;  %v132_v40 = vadd.f32 %v116_v18, %v72_v62  ;;  %673 = vtanh.f32 %v174_v24  ;;  %v664_v45 = vpop.eup %663  ;;  %v133_v38 = vadd.f32 %v117_v25, %v73_v2 }
  0x89   :  { %v140_v28 = vadd.f32 %v124_v11, %v80_v14  ;;  %v141_v29 = vadd.f32 %v125_v12, %v81_v15  ;;  %v142_v30 = vadd.f32 %v126_v22, %v82_v16  ;;  %v143_v32 = vadd.f32 %v127_v23, %v83_v20  ;;  %v666_v46 = vpop.eup %665  ;;  %v230_v16 = vpop.permute.xlu2 %229 }
  0x8a   :  { %675 = vtanh.f32 %v175_v27  ;;  %v134_v47 = vadd.f32 %v118_v26, %v74_v6  ;;  %v668_v48 = vpop.eup %667  ;;  %v135_v49 = vadd.f32 %v119_v34, %v75_v33 }
  0x8b   :  { %v670_v51 = vpop.eup %669 }
  0x8c   :  { %v672_v53 = vpop.eup %671 }
  0x8d   :  { %v162_v36 = vpop.permute.xlu1 %161 }
  0x8e   :  { %v176_v41 = vadd.f32 %v162_v36, %v140_v28  ;;  %v177_v43 = vadd.f32 %v162_v36, %v141_v29  ;;  %v178_v44 = vadd.f32 %v162_v36, %v142_v30  ;;  %v152_v42 = vpop.permute.xlu0 %151  ;;  %v179_v35 = vadd.f32 %v162_v36, %v143_v32  ;;  %v674_v55 = vpop.eup %673 }
  0x8f   :  { %v168_v39 = vadd.f32 %v152_v42, %v132_v40  ;;  %v169_v50 = vadd.f32 %v152_v42, %v133_v38  ;;  %v170_v52 = vadd.f32 %v152_v42, %v134_v47  ;;  %v171_v54 = vadd.f32 %v152_v42, %v135_v49 }
  0x90   :  { %677 = vtanh.f32 %v176_v41  ;;  %v676_v19 = vpop.eup %675 }
  0x91   :  { %679 = vtanh.f32 %v177_v43  ;;  %v220_v34 = vpop.permute.xlu2 %219 }
  0x92   :  { %681 = vtanh.f32 %v178_v44 }
  0x93   :  { %683 = vtanh.f32 %v179_v35 }
  0x94   :  { %685 = vtanh.f32 %v168_v39 }
  0x95   :  { %687 = vtanh.f32 %v169_v50  ;;  %v225_v15 = vpop.permute.xlu1 %224 }
  0x96   :  { %v678_v37 = vpop.eup %677  ;;  %689 = vtanh.f32 %v170_v52 }
  0x97   :  { %v680_v56 = vpop.eup %679  ;;  %691 = vtanh.f32 %v171_v54  ;;  %v208_v57 = vpack.c.bf16 %v678_v37, %v670_v51 }
  0x98   :  { %v682_v58 = vpop.eup %681  ;;  %v209_v59 = vpack.c.bf16 %v680_v56, %v672_v53 }
  0x99   :  { %v684_v60 = vpop.eup %683  ;;  %255 = vmatpush.bf16.msra.mxu0 %v208_v57  ;;  %v210_v61 = vpack.c.bf16 %v682_v58, %v674_v55 }
  0x9a   :  { %v686_v62 = vpop.eup %685  ;;  %274 = vmatpush.bf16.msra.mxu1 %v209_v59  ;;  %v211_v63 = vpack.c.bf16 %v684_v60, %v676_v19  ;;  %v651_v60 = vld [vmem:[%s925_s3 + $0x10] sm:$0xff] }
  0x9b   :  { %v688_v0 = vpop.eup %687  ;;  %293 = vmatpush.bf16.msra.mxu2 %v210_v61  ;;  %v204_v1 = vpack.c.bf16 %v686_v62, %v662_v31 }
  0x9c   :  { %v690_v2 = vpop.eup %689  ;;  %312 = vmatpush.bf16.msra.mxu3 %v211_v63  ;;  %v205_v3 = vpack.c.bf16 %v688_v0, %v664_v45 }
  0x9d   :  { %v692_v5 = vpop.eup %691  ;;  %256 = vmatpush.bf16.msra.mxu0 %v204_v1  ;;  %v206_v6 = vpack.c.bf16 %v690_v2, %v666_v46  ;;  %v215_v22 = vpop.permute.xlu1 %214 }
  0x9e   :  { %275 = vmatpush.bf16.msra.mxu1 %v205_v3  ;;  %v207_v7 = vpack.c.bf16 %v692_v5, %v668_v48 }
  0x9f   :  { %294 = vmatpush.bf16.msra.mxu2 %v206_v6  ;;  %v652_v6 = vld [vmem:[%s925_s3 + $0x18] sm:$0xff] }
  0xa0   :  { %313 = vmatpush.bf16.msra.mxu3 %v207_v7  ;;  %613 = vmatmul.msk.bf16.vlgmr.msra.gmra.mxu0 %vm242_vm0, %v649_v4 }
  0xa1   :  { %615 = vmatmul.msk.bf16.vlgmr.msra.gmra.mxu1 %vm242_vm0, %v649_v4 }
  0xa2   :  { %617 = vmatmul.msk.bf16.vlgmr.msra.gmra.mxu2 %vm242_vm0, %v649_v4 }
  0xa3   :  { %619 = vmatmul.msk.bf16.vlgmr.msra.gmra.mxu3 %vm242_vm0, %v649_v4 }
  0xb0   :  { %614 = vmatmul.msk.bf16.gmra.mxu0 %vm242_vm0, %v650_v8 }
  0xb1   :  { %616 = vmatmul.msk.bf16.gmra.mxu1 %vm242_vm0, %v650_v8 }
  0xb2   :  { %618 = vmatmul.msk.bf16.gmra.mxu2 %vm242_vm0, %v650_v8 }
  0xb3   :  { %620 = vmatmul.msk.bf16.gmra.mxu3 %vm242_vm0, %v650_v8 }
 0x11d   :  { %v258_v9 = vpop.f32.mrf.mxu0 }
 0x11e   :  { %v277_v10 = vpop.f32.mrf.mxu1  ;;  %v259_v23 = vadd.f32 %v258_v9, %v215_v22 }
 0x11f   :  { %v278_v24 = vadd.f32 %v277_v10, %v215_v22 }
 0x120   :  { %693 = vtanh.f32 %v259_v23 }
 0x121   :  { %695 = vtanh.f32 %v278_v24  ;;  %v367_v24 = vpop.permute.xlu2 %366 }
 0x125   :  { %v296_v11 = vpop.f32.mrf.mxu2  ;;  %v260_v12 = vpop.f32.mrf.mxu0 }
 0x126   :  { %v315_v13 = vpop.f32.mrf.mxu3  ;;  %v279_v14 = vpop.f32.mrf.mxu1  ;;  %v261_v32 = vadd.f32 %v260_v12, %v220_v34  ;;  %v297_v50 = vadd.f32 %v296_v11, %v215_v22 }
 0x127   :  { %v280_v40 = vadd.f32 %v279_v14, %v220_v34  ;;  %v694_v44 = vpop.eup %693  ;;  %v316_v52 = vadd.f32 %v315_v13, %v215_v22 }
 0x128   :  { %v696_v42 = vpop.eup %695 }
 0x12d   :  { %v298_v17 = vpop.f32.mrf.mxu2  ;;  %v263_v18 = vpop.f32.mrf.mxu0 }
 0x12e   :  { %v317_v20 = vpop.f32.mrf.mxu3  ;;  %v282_v21 = vpop.f32.mrf.mxu1  ;;  %v264_v25 = vadd.f32 %v263_v18, %v225_v15  ;;  %v299_v35 = vadd.f32 %v298_v17, %v220_v34 }
 0x12f   :  { %v283_v26 = vadd.f32 %v282_v21, %v225_v15  ;;  %v318_v39 = vadd.f32 %v317_v20, %v220_v34  ;;  %v372_v18 = vpop.permute.xlu1 %371 }
 0x130   :  { %697 = vtanh.f32 %v264_v25 }
 0x131   :  { %699 = vtanh.f32 %v283_v26 }
 0x135   :  { %v301_v27 = vpop.f32.mrf.mxu2  ;;  %v265_v28 = vpop.f32.mrf.mxu0 }
 0x136   :  { %v320_v29 = vpop.f32.mrf.mxu3  ;;  %v266_v30 = vadd.f32 %v265_v28, %v230_v16  ;;  %v284_v31 = vpop.f32.mrf.mxu1  ;;  %v302_v41 = vadd.f32 %v301_v27, %v225_v15 }
 0x137   :  { %v285_v36 = vadd.f32 %v284_v31, %v230_v16  ;;  %v321_v43 = vadd.f32 %v320_v29, %v225_v15  ;;  %v698_v33 = vpop.eup %697  ;;  %v377_v15 = vpop.permute.xlu0 %376 }
 0x138   :  { %701 = vtanh.f32 %v266_v30  ;;  %v700_v47 = vpop.eup %699 }
 0x139   :  { %703 = vtanh.f32 %v285_v36 }
 0x13a   :  { %705 = vtanh.f32 %v261_v32 }
 0x13b   :  { %707 = vtanh.f32 %v280_v40 }
 0x13c   :  { %709 = vtanh.f32 %v302_v41 }
 0x13d   :  { %v303_v45 = vpop.f32.mrf.mxu2  ;;  %711 = vtanh.f32 %v321_v43 }
 0x13e   :  { %v304_v38 = vadd.f32 %v303_v45, %v230_v16  ;;  %v322_v46 = vpop.f32.mrf.mxu3  ;;  %v702_v49 = vpop.eup %701 }
 0x13f   :  { %v323_v48 = vadd.f32 %v322_v46, %v230_v16  ;;  %v704_v51 = vpop.eup %703  ;;  %v355_v53 = vpack.c.bf16 %v702_v49, %v698_v33  ;;  %v362_v28 = vpop.permute.xlu0 %361 }
 0x140   :  { %713 = vtanh.f32 %v304_v38  ;;  %v706_v54 = vpop.eup %705  ;;  %v356_v55 = vpack.c.bf16 %v704_v51, %v700_v47  ;;  %v33_v51 = vld [vmem:[%s927_s5] sm:$0x1]  ;;  %s785_s5 = smov [#allocation2]  }
 0x141   :  { %715 = vtanh.f32 %v323_v48  ;;  %v708_v19 = vpop.eup %707  ;;  %401 = vmatpush.bf16.msrb.mxu0 %v355_v53  ;;  %v351_v57 = vpack.c.bf16 %v706_v54, %v694_v44  ;;  %s594_s11 = sshll.u32 %s785_s5, 4  ;;  %s595_s11 = int_to_ptr.vmem [resolvable:$true] %s594_s11 }
 0x142   :  { %717 = vtanh.f32 %v299_v35  ;;  %v710_v37 = vpop.eup %709  ;;  %420 = vmatpush.bf16.msrb.mxu1 %v356_v55  ;;  %v352_v59 = vpack.c.bf16 %v708_v19, %v696_v42 }
 0x143   :  { %719 = vtanh.f32 %v318_v39  ;;  %v712_v56 = vpop.eup %711 }
 0x144   :  { %721 = vtanh.f32 %v297_v50 }
 0x145   :  { %723 = vtanh.f32 %v316_v52  ;;  %402 = vmatpush.bf16.msrb.mxu0 %v351_v57 }
 0x146   :  { %v714_v58 = vpop.eup %713  ;;  %421 = vmatpush.bf16.msrb.mxu1 %v352_v59 }
 0x147   :  { %v716_v61 = vpop.eup %715  ;;  %v357_v62 = vpack.c.bf16 %v714_v58, %v710_v37 }
 0x148   :  { %v718_v63 = vpop.eup %717  ;;  %v358_v0 = vpack.c.bf16 %v716_v61, %v712_v56  ;;  %637 = vmatmul.msk.bf16.vlgmr.msrb.gmra.mxu0 %vm242_vm0, %v651_v60 }
 0x149   :  { %v720_v1 = vpop.eup %719  ;;  %439 = vmatpush.bf16.msrb.mxu2 %v357_v62  ;;  %639 = vmatmul.msk.bf16.vlgmr.msrb.gmra.mxu1 %vm242_vm0, %v651_v60 }
 0x14a   :  { %v722_v2 = vpop.eup %721  ;;  %458 = vmatpush.bf16.msrb.mxu3 %v358_v0 }
 0x14b   :  { %v724_v3 = vpop.eup %723  ;;  %v353_v4 = vpack.c.bf16 %v718_v63, %v722_v2  ;;  %v584_v63 = vlaneseq }
 0x14c   :  { %v354_v5 = vpack.c.bf16 %v720_v1, %v724_v3 }
 0x14d   :  { %440 = vmatpush.bf16.msrb.mxu2 %v353_v4  ;;  %vm586_vm4 = vcmp.lt.s32.totalorder %v584_v63, 512 }
 0x14e   :  { %459 = vmatpush.bf16.msrb.mxu3 %v354_v5 }
 0x150   :  { %641 = vmatmul.msk.bf16.vlgmr.msrb.gmra.mxu2 %vm242_vm0, %v651_v60 }
 0x151   :  { %643 = vmatmul.msk.bf16.vlgmr.msrb.gmra.mxu3 %vm242_vm0, %v651_v60 }
 0x158   :  { %638 = vmatmul.msk.bf16.gmra.mxu0 %vm242_vm0, %v652_v6 }
 0x159   :  { %640 = vmatmul.msk.bf16.gmra.mxu1 %vm242_vm0, %v652_v6 }
 0x160   :  { %642 = vmatmul.msk.bf16.gmra.mxu2 %vm242_vm0, %v652_v6 }
 0x161   :  { %644 = vmatmul.msk.bf16.gmra.mxu3 %vm242_vm0, %v652_v6 }
 0x1c5   :  { %v404_v7 = vpop.f32.mrf.mxu0 }
 0x1c6   :  { %v423_v8 = vpop.f32.mrf.mxu1  ;;  %v405_v31 = vadd.f32 %v404_v7, %v362_v28 }
 0x1c7   :  { %v424_v36 = vadd.f32 %v423_v8, %v362_v28 }
 0x1cd   :  { %v406_v9 = vpop.f32.mrf.mxu0 }
 0x1ce   :  { %v425_v10 = vpop.f32.mrf.mxu1  ;;  %v407_v27 = vadd.f32 %v406_v9, %v367_v24 }
 0x1cf   :  { %v426_v29 = vadd.f32 %v425_v10, %v367_v24 }
 0x1d3   :  { %v442_v11 = vpop.f32.mrf.mxu2 }
 0x1d4   :  { %v461_v12 = vpop.f32.mrf.mxu3  ;;  %v443_v52 = vadd.f32 %v442_v11, %v362_v28 }
 0x1d5   :  { %v409_v13 = vpop.f32.mrf.mxu0  ;;  %v462_v53 = vadd.f32 %v461_v12, %v362_v28 }
 0x1d6   :  { %v428_v14 = vpop.f32.mrf.mxu1  ;;  %v410_v21 = vadd.f32 %v409_v13, %v372_v18 }
 0x1d7   :  { %v429_v25 = vadd.f32 %v428_v14, %v372_v18 }
 0x1db   :  { %v444_v16 = vpop.f32.mrf.mxu2 }
 0x1dc   :  { %v463_v17 = vpop.f32.mrf.mxu3  ;;  %v445_v48 = vadd.f32 %v444_v16, %v367_v24 }
 0x1dd   :  { %v411_v20 = vpop.f32.mrf.mxu0  ;;  %v464_v50 = vadd.f32 %v463_v17, %v367_v24 }
 0x1de   :  { %v412_v22 = vadd.f32 %v411_v20, %v377_v15  ;;  %v430_v23 = vpop.f32.mrf.mxu1 }
 0x1df   :  { %v431_v26 = vadd.f32 %v430_v23, %v377_v15 }
 0x1e0   :  { %725 = vtanh.f32 %v412_v22 }
 0x1e1   :  { %727 = vtanh.f32 %v431_v26 }
 0x1e2   :  { %729 = vtanh.f32 %v410_v21 }
 0x1e3   :  { %v447_v30 = vpop.f32.mrf.mxu2  ;;  %731 = vtanh.f32 %v429_v25 }
 0x1e4   :  { %v466_v34 = vpop.f32.mrf.mxu3  ;;  %733 = vtanh.f32 %v407_v27  ;;  %v448_v45 = vadd.f32 %v447_v30, %v372_v18 }
 0x1e5   :  { %735 = vtanh.f32 %v426_v29  ;;  %v467_v46 = vadd.f32 %v466_v34, %v372_v18 }
 0x1e6   :  { %v726_v32 = vpop.eup %725  ;;  %737 = vtanh.f32 %v405_v31 }
 0x1e7   :  { %v728_v40 = vpop.eup %727  ;;  %739 = vtanh.f32 %v424_v36  ;;  %502 = vmatpush.msra.mxu0 %v726_v32 }
 0x1e8   :  { %v730_v41 = vpop.eup %729  ;;  %522 = vmatpush.msra.mxu1 %v728_v40 }
 0x1e9   :  { %v732_v43 = vpop.eup %731  ;;  %503 = vmatpush.msra.mxu0 %v730_v41 }
 0x1ea   :  { %v734_v42 = vpop.eup %733  ;;  %523 = vmatpush.msra.mxu1 %v732_v43 }
 0x1eb   :  { %v449_v44 = vpop.f32.mrf.mxu2  ;;  %v736_v38 = vpop.eup %735  ;;  %504 = vmatpush.msra.mxu0 %v734_v42 }
 0x1ec   :  { %v450_v33 = vadd.f32 %v449_v44, %v377_v15  ;;  %v468_v35 = vpop.f32.mrf.mxu3  ;;  %v738_v39 = vpop.eup %737  ;;  %524 = vmatpush.msra.mxu1 %v736_v38 }
 0x1ed   :  { %v469_v47 = vadd.f32 %v468_v35, %v377_v15  ;;  %v740_v49 = vpop.eup %739  ;;  %505 = vmatpush.msra.mxu0 %v738_v39 }
 0x1ee   :  { %741 = vtanh.f32 %v450_v33  ;;  %525 = vmatpush.msra.mxu1 %v740_v49  ;;  %645 = vmatmul.msk.f32.vlgmr.msra.gmra.mxu0 %vm242_vm0, %v33_v51 }
 0x1ef   :  { %743 = vtanh.f32 %v469_v47  ;;  %646 = vmatmul.msk.f32.vlgmr.msra.gmra.mxu1 %vm242_vm0, %v33_v51 }
 0x1f0   :  { %745 = vtanh.f32 %v448_v45 }
 0x1f1   :  { %747 = vtanh.f32 %v467_v46 }
 0x1f2   :  { %749 = vtanh.f32 %v445_v48 }
 0x1f3   :  { %751 = vtanh.f32 %v464_v50 }
 0x1f4   :  { %v742_v54 = vpop.eup %741  ;;  %753 = vtanh.f32 %v443_v52 }
 0x1f5   :  { %v744_v55 = vpop.eup %743  ;;  %755 = vtanh.f32 %v462_v53  ;;  %542 = vmatpush.msra.mxu2 %v742_v54 }
 0x1f6   :  { %v746_v19 = vpop.eup %745  ;;  %562 = vmatpush.msra.mxu3 %v744_v55 }
 0x1f7   :  { %v748_v37 = vpop.eup %747  ;;  %543 = vmatpush.msra.mxu2 %v746_v19 }
 0x1f8   :  { %v750_v56 = vpop.eup %749  ;;  %563 = vmatpush.msra.mxu3 %v748_v37 }
 0x1f9   :  { %v752_v57 = vpop.eup %751  ;;  %544 = vmatpush.msra.mxu2 %v750_v56 }
 0x1fa   :  { %v754_v58 = vpop.eup %753  ;;  %564 = vmatpush.msra.mxu3 %v752_v57 }
 0x1fb   :  { %v756_v59 = vpop.eup %755  ;;  %545 = vmatpush.msra.mxu2 %v754_v58 }
 0x1fc   :  { %565 = vmatpush.msra.mxu3 %v756_v59  ;;  %647 = vmatmul.msk.f32.vlgmr.msra.gmra.mxu2 %vm242_vm0, %v33_v51 }
 0x1fd   :  { %648 = vmatmul.msk.f32.vlgmr.msra.gmra.mxu3 %vm242_vm0, %v33_v51 }
 0x26b   :  { %v507_v62 = vpop.f32.mrf.mxu0 }
 0x26c   :  { %v527_v60 = vpop.f32.mrf.mxu1 }
 0x26d   :  { %v574_v61 = vrot.slane %v527_v60, 7 }
 0x26f   :  { %v578_v4 = vsel %vm577_vm1, %v507_v62, %v574_v61 }
 0x27f   :  { %v547_v0 = vpop.f32.mrf.mxu2 }
 0x280   :  { %v575_v1 = vrot.slane %v547_v0, 6  ;;  %v567_v2 = vpop.f32.mrf.mxu3 }
 0x281   :  { %v576_v3 = vrot.slane %v567_v2, 5 }
 0x283   :  { %v580_v5 = vsel %vm579_vm2, %v575_v1, %v576_v3 }
 0x284   :  { %v582_v6 = vsel %vm581_vm3, %v578_v4, %v580_v5 }
 0x285   :  { %588 = vst.msk [vmem:[#allocation2] sm:$0xf] %vm586_vm4, %v582_v6 }
 0x286   :  { %599 = dma.vmem_to_hbm [thread:$0]  %s595_s11, 64, %s597_s14, [#allocation3]  }
 0x287   :  { %781 = dma.done.wait [#allocation3], 64  }
 0x288   :  { %782 = vsyncadd [#allocation3], 4294967232 }
 0x289   :  { %604 = vsyncpa [#allocation3], 1 }

</bundles_post_ra>
